<compile_context>
chip_gen: v7x
topology: tpu7x:2x2x1
jax: 0.10.0
libtpu: 0.0.40
codegen_flags: <defaults>
</compile_context>

<pallas_src>
import functools

import jax
import jax.numpy as jnp
from jax import lax
from jax.experimental import pallas as pl
from jax.experimental.pallas import tpu as pltpu


def _round_up(x, m):
    return ((x + m - 1) // m) * m


def _vmem_capacity_bytes():
    """Physical VMEM of the local TPU generation; conservative fallback (v7x = 64 MiB)."""
    try:
        info = pltpu.get_tpu_info()
        for name in ("vmem_capacity_bytes", "vmem_bytes", "vmem_size_bytes"):
            v = getattr(info, name, None)
            if v:
                return int(v)
    except Exception:
        pass
    return 64 * 1024 * 1024


def _choose_config(M, dim_p, hid_p, x_bytes, w_bytes, out_bytes, acc_in_out, budget,
                   tm_pref, th_pref):
    """Pick (row tile, hidden chunk, weights_resident) from a per-step VMEM footprint."""
    sub = {1: 32, 2: 16}.get(x_bytes, 8)  # sublane packing multiple for the row tile

    # Hidden-chunk candidates: largest divisor of the padded hidden first (512 before 256).
    th_cands = []
    for c in (th_pref, 512, 384, 256, 128):
        if c and c % 128 == 0 and c <= hid_p and hid_p % c == 0 and c not in th_cands:
            th_cands.append(c)
    if not th_cands:
        th_cands = [128]

    # Row-tile candidates: large first (bf16 can use 1024), clamped to the token count.
    row_cap = _round_up(max(M, 1), sub)
    base_tms = (1024, 768, 512, 384, 256, 128, 64, 32, 16, 8)
    tm_cands = set()
    for c in (tm_pref,) + base_tms:
        if c and c % sub == 0:
            tm_cands.add(min(c, row_cap))
    tm_cands = sorted(tm_cands, reverse=True)

    def fits(tm, th, resident):
        acc = 0 if acc_in_out else tm * dim_p * 4          # f32 accumulator scratch
        tmp = tm * dim_p * 4 + 3 * tm * th * 4             # dot result + GELU temporaries
        io = 2 * tm * dim_p * (x_bytes + out_bytes)        # double-buffered x / out tiles
        if resident:
            w = 2 * (dim_p * hid_p + hid_p + hid_p * dim_p + dim_p) * w_bytes
        else:
            w = 2 * (dim_p * th + th + th * dim_p + dim_p) * w_bytes
        return acc + tmp + io + w + (2 << 20) <= budget

    # Prefer fully VMEM-resident weights (loaded once), then the biggest row tile.
    for resident in (True, False):
        for tm in tm_cands:
            for th in th_cands:
                if fits(tm, th, resident):
                    return tm, th, resident
    return sub, 128, False  # last-resort fallback


def _mlp_kernel(x_ref, w1_ref, b1_ref, w2_ref, b2_ref, o_ref, *scratch,
                th_eff, weights_resident, acc_in_out):
    # x_ref: (tm, dim_p)                          o_ref: (tm, dim_p)
    # resident : w1_ref (dim_p, hid_p), b1_ref (1, hid_p), w2_ref (hid_p, dim_p)
    # streamed : w1_ref (dim_p, th),    b1_ref (1, th),    w2_ref (th, dim_p)
    # b2_ref: (1, dim_p)
    acc_ref = o_ref if acc_in_out else scratch[0]
    j = pl.program_id(1)

    @pl.when(j == 0)
    def _init():
        # Fold the second-layer bias into the accumulator init (saves a finalize add).
        acc_ref[...] = jnp.broadcast_to(
            b2_ref[...].astype(acc_ref.dtype), acc_ref.shape)

    if weights_resident:
        off = pl.multiple_of(j * th_eff, 128)
        w1 = w1_ref[:, pl.ds(off, th_eff)]
        b1 = b1_ref[:, pl.ds(off, th_eff)]
        w2 = w2_ref[pl.ds(off, th_eff), :]
    else:
        w1 = w1_ref[...]
        b1 = b1_ref[...]
        w2 = w2_ref[...]

    # Linear 1 (partial over this hidden chunk); f32 accumulation on the MXU.
    h = jnp.dot(x_ref[...], w1, preferred_element_type=jnp.float32)
    h = h + b1.astype(jnp.float32)

    # Exact GELU (erf-based, matches PyTorch nn.GELU() default). GELU(0) == 0, so the
    # zero-padded hidden columns contribute nothing to the second matmul.
    h = 0.5 * h * (1.0 + lax.erf(h * 0.7071067811865476))

    # Dropout (inference): identity.

    # Linear 2 (partial over this hidden chunk), accumulated in f32.
    acc_ref[...] += jnp.dot(h.astype(w2.dtype), w2,
                            preferred_element_type=jnp.float32).astype(acc_ref.dtype)

    if not acc_in_out:
        @pl.when(j == pl.num_programs(1) - 1)
        def _finalize():
            o_ref[...] = acc_ref[...].astype(o_ref.dtype)


@functools.partial(jax.jit, static_argnames=("tm", "th", "weights_dtype"))
def mlp_block(x, w1, b1, w2, b2, *, tm=None, th=None, weights_dtype=None):
    """Fused MLP block (inference): x @ W1 + b1 -> GELU -> @ W2 + b2.

    x: [B, S, dim].  Weights are stored (in, out), i.e. the transpose of torch's
    nn.Linear.weight.  Optionally cast weights (e.g. to jnp.bfloat16) via weights_dtype
    for the fast bf16 MXU path (f32 accumulation is kept either way).
    """
    B, S, dim = x.shape
    hidden = w1.shape[1]
    M = B * S

    if weights_dtype is not None:
        w1 = w1.astype(weights_dtype)
        w2 = w2.astype(weights_dtype)
        b1 = b1.astype(weights_dtype)
        b2 = b2.astype(weights_dtype)

    # Lane-dense padding targets (multiples of 128 on the feature dims).
    dim_p = _round_up(dim, 128)
    hid_p = _round_up(hidden, 128)

    x_bytes = jnp.dtype(x.dtype).itemsize
    w_bytes = jnp.dtype(w1.dtype).itemsize
    out_dtype = x.dtype
    out_bytes = x_bytes
    acc_in_out = jnp.dtype(out_dtype) == jnp.float32  # accumulate straight into o_ref

    # Generation-aware VMEM budget (v5e/v6e: 128 MiB, v7x: 64 MiB) with headroom.
    cap = _vmem_capacity_bytes()
    budget = min(int(cap * 0.8), cap - (8 << 20))

    tm_eff, th_eff, resident = _choose_config(
        M, dim_p, hid_p, x_bytes, w_bytes, out_bytes, acc_in_out, budget, tm, th)

    # v7x has 2 TensorCores; keep >= 2 blocks on the "parallel" row axis whenever the
    # weights are VMEM-resident (splitting the rows is then essentially free).
    sub = {1: 32, 2: 16}.get(x_bytes, 8)
    if resident and M > sub and _round_up(M, tm_eff) // tm_eff < 2:
        tm_eff = min(tm_eff, max(sub, _round_up((M + 1) // 2, sub)))

    M_p = _round_up(M, tm_eff)

    # Pad operands only when needed (zero pads are exactly neutral through
    # bias / GELU / matmul, and padded output columns/rows are sliced off).
    x2d = x.reshape(M, dim)
    if (M_p, dim_p) != (M, dim):
        x_p = jnp.zeros((M_p, dim_p), x.dtype).at[:M, :dim].set(x2d)
    else:
        x_p = x2d
    if (dim_p, hid_p) != (dim, hidden):
        w1_p = jnp.zeros((dim_p, hid_p), w1.dtype).at[:dim, :hidden].set(w1)
        w2_p = jnp.zeros((hid_p, dim_p), w2.dtype).at[:hidden, :dim].set(w2)
    else:
        w1_p, w2_p = w1, w2
    if hid_p != hidden:
        b1_p = jnp.zeros((1, hid_p), b1.dtype).at[0, :hidden].set(b1)
    else:
        b1_p = b1.reshape(1, hidden)
    if dim_p != dim:
        b2_p = jnp.zeros((1, dim_p), b2.dtype).at[0, :dim].set(b2)
    else:
        b2_p = b2.reshape(1, dim)

    grid = (M_p // tm_eff, hid_p // th_eff)

    if resident:
        # Full-array weight blocks, constant index_map -> DMA'd once, never re-streamed.
        w1_spec = pl.BlockSpec((dim_p, hid_p), lambda i, j: (0, 0))
        b1_spec = pl.BlockSpec((1, hid_p), lambda i, j: (0, 0))
        w2_spec = pl.BlockSpec((hid_p, dim_p), lambda i, j: (0, 0))
    else:
        w1_spec = pl.BlockSpec((dim_p, th_eff), lambda i, j: (0, j))
        b1_spec = pl.BlockSpec((1, th_eff), lambda i, j: (0, j))
        w2_spec = pl.BlockSpec((th_eff, dim_p), lambda i, j: (j, 0))

    kernel = functools.partial(_mlp_kernel, th_eff=th_eff,
                               weights_resident=resident, acc_in_out=acc_in_out)
    scratch = [] if acc_in_out else [pltpu.VMEM((tm_eff, dim_p), jnp.float32)]
    vmem_limit = int(min(cap * 0.95, budget + (16 << 20)))

    out_p = pl.pallas_call(
        kernel,
        out_shape=jax.ShapeDtypeStruct((M_p, dim_p), out_dtype),
        grid_spec=pltpu.PrefetchScalarGridSpec(
            num_scalar_prefetch=0,
            grid=grid,
            in_specs=[
                pl.BlockSpec((tm_eff, dim_p), lambda i, j: (i, 0)),  # x rows
                w1_spec,
                b1_spec,
                w2_spec,
                pl.BlockSpec((1, dim_p), lambda i, j: (0, 0)),       # b2 (constant)
            ],
            out_specs=pl.BlockSpec((tm_eff, dim_p), lambda i, j: (i, 0)),
            scratch_shapes=scratch,
        ),
        compiler_params=pltpu.CompilerParams(
            dimension_semantics=("parallel", "arbitrary"),
            vmem_limit_bytes=vmem_limit,
        ),
    )(x_p, w1_p, b1_p, w2_p, b2_p)

    if (M_p, dim_p) != (M, dim):
        out_p = out_p[:M, :dim]
    return out_p.reshape(B, S, dim)


def _reference(x, w1, b1, w2, b2):
    h = jnp.dot(x, w1, precision=lax.Precision.HIGHEST) + b1
    h = 0.5 * h * (1.0 + lax.erf(h * 0.7071067811865476))
    return jnp.dot(h, w2, precision=lax.Precision.HIGHEST) + b2


def _make_inputs(key, B, S, dim, hidden, dtype=jnp.float32):
    kx, kw1, kb1, kw2, kb2 = jax.random.split(key, 5)
    x = jax.random.normal(kx, (B, S, dim), dtype=dtype)
    w1 = jax.random.normal(kw1, (dim, hidden), dtype=dtype) * (1.0 / jnp.sqrt(dim))
    b1 = jax.random.normal(kb1, (hidden,), dtype=dtype) * 0.01
    w2 = jax.random.normal(kw2, (hidden, dim), dtype=dtype) * (1.0 / jnp.sqrt(hidden))
    b2 = jax.random.normal(kb2, (dim,), dtype=dtype) * 0.01
    return x, w1, b1, w2, b2


if __name__ == "__main__":
    key = jax.random.PRNGKey(0)
    k1, k2 = jax.random.split(key, 2)

    # Test 1: small, unaligned dims (exercises padding + tiny-row tiling).
    B, S, dim, hidden = 2, 8, 32, 64
    x, w1, b1, w2, b2 = _make_inputs(k1, B, S, dim, hidden)
    out = jax.block_until_ready(mlp_block(x, w1, b1, w2, b2))
    ref = _reference(x, w1, b1, w2, b2)
    assert out.shape == (B, S, dim)
    assert jnp.allclose(out, ref, atol=1e-4, rtol=1e-4), "mismatch vs reference (test 1)"

    # Test 2: lane-aligned dims with multiple hidden chunks and multiple row blocks
    # (exercises the no-pad path, resident weights and the hidden-axis accumulation).
    B2, S2, dim2, hidden2 = 2, 64, 128, 1024
    x2, w12, b12, w22, b22 = _make_inputs(k2, B2, S2, dim2, hidden2)
    out2 = jax.block_until_ready(mlp_block(x2, w12, b12, w22, b22))
    ref2 = _reference(x2, w12, b12, w22, b22)
    assert out2.shape == (B2, S2, dim2)
    assert jnp.allclose(out2, ref2, atol=2e-3, rtol=2e-3), "mismatch vs reference (test 2)"

    print("KERNEL_OK")
</pallas_src>

<mosaic_0001>
module attributes {stable_mosaic.version = 11 : i64} {
  func.func @_mlp_kernel(%arg0: i32, %arg1: i32, %arg2: memref<8x128xf32, #tpu.memory_space<vmem>>, %arg3: memref<128x128xf32, #tpu.memory_space<vmem>>, %arg4: memref<1x128xf32, #tpu.memory_space<vmem>>, %arg5: memref<128x128xf32, #tpu.memory_space<vmem>>, %arg6: memref<1x128xf32, #tpu.memory_space<vmem>>, %arg7: memref<8x128xf32, #tpu.memory_space<vmem>>) attributes {dimension_semantics = [#tpu.dimension_semantics<parallel>, #tpu.dimension_semantics<arbitrary>], iteration_bounds = array<i64: 2, 1>, scalar_prefetch = 0 : i64, scratch_operands = 0 : i64, tpu.core_type = #tpu.core_type<tc>, window_params = [{transform_indices = @transform_0, window_bounds = array<i64: 8, 128>}, {pipeline_mode = #tpu.pipeline_mode<synchronous>, transform_indices = @transform_1, window_bounds = array<i64: 128, 128>}, {pipeline_mode = #tpu.pipeline_mode<synchronous>, transform_indices = @transform_2, window_bounds = array<i64: 1, 128>}, {pipeline_mode = #tpu.pipeline_mode<synchronous>, transform_indices = @transform_3, window_bounds = array<i64: 128, 128>}, {pipeline_mode = #tpu.pipeline_mode<synchronous>, transform_indices = @transform_4, window_bounds = array<i64: 1, 128>}, {transform_indices = @transform_5, window_bounds = array<i64: 8, 128>}]} {
    %c0_i32 = arith.constant 0 : i32
    %0 = arith.cmpi eq, %arg1, %c0_i32 : i32
    %1 = arith.extui %0 : i1 to i32
    %c0_i32_0 = arith.constant 0 : i32
    %2 = arith.cmpi ne, %1, %c0_i32_0 : i32
    scf.if %2 {
      %c0_13 = arith.constant 0 : index
      %c0_14 = arith.constant 0 : index
      %27 = vector.load %arg6[%c0_13, %c0_14] : memref<1x128xf32, #tpu.memory_space<vmem>>, vector<1x128xf32>
      %28 = vector.shape_cast %27 : vector<1x128xf32> to vector<1x128xf32>
      %29 = vector.broadcast %28 : vector<1x128xf32> to vector<8x128xf32>
      %c0_15 = arith.constant 0 : index
      %c0_16 = arith.constant 0 : index
      %30 = vector.load %arg7[%c0_15, %c0_16] : memref<8x128xf32, #tpu.memory_space<vmem>>, vector<8x128xf32>
      tpu.vector_store %arg7[%c0_15, %c0_16], %29 {strides = array<i32>} : memref<8x128xf32, #tpu.memory_space<vmem>>, vector<8x128xf32>,
    } else {
    }
    %c128_i32 = arith.constant 128 : i32
    %3 = arith.muli %arg1, %c128_i32 : i32
    %4 = tpu.assume_multiple %3, 128 : i32
    %c0 = arith.constant 0 : index
    %5 = arith.index_cast %4 : i32 to index
    %6 = vector.load %arg3[%c0, %5] : memref<128x128xf32, #tpu.memory_space<vmem>>, vector<128x128xf32>
    %c0_1 = arith.constant 0 : index
    %7 = arith.index_cast %4 : i32 to index
    %8 = vector.load %arg4[%c0_1, %7] : memref<1x128xf32, #tpu.memory_space<vmem>>, vector<1x128xf32>
    %9 = arith.index_cast %4 : i32 to index
    %c0_2 = arith.constant 0 : index
    %10 = vector.load %arg5[%9, %c0_2] : memref<128x128xf32, #tpu.memory_space<vmem>>, vector<128x128xf32>
    %c0_3 = arith.constant 0 : index
    %c0_4 = arith.constant 0 : index
    %11 = vector.load %arg2[%c0_3, %c0_4] : memref<8x128xf32, #tpu.memory_space<vmem>>, vector<8x128xf32>
    %cst = arith.constant dense<0.000000e+00> : vector<8x128xf32>
    %12 = tpu.matmul %11, %6, %cst {dimension_numbers = #tpu.dot_dimension_numbers<[1], [0], [0], [1], [0, 0, 1, 1], [], []>} : vector<8x128xf32>, vector<128x128xf32>, vector<8x128xf32> -> vector<8x128xf32>
    %13 = vector.broadcast %8 : vector<1x128xf32> to vector<8x128xf32>
    %14 = arith.addf %12, %13 : vector<8x128xf32>
    %cst_5 = arith.constant 5.000000e-01 : f32
    %15 = vector.broadcast %cst_5 : f32 to vector<8x128xf32>
    %16 = arith.mulf %15, %14 : vector<8x128xf32>
    %cst_6 = arith.constant 0.707106769 : f32
    %17 = vector.broadcast %cst_6 : f32 to vector<8x128xf32>
    %18 = arith.mulf %14, %17 : vector<8x128xf32>
    %19 = math.erf %18 : vector<8x128xf32>
    %cst_7 = arith.constant 1.000000e+00 : f32
    %20 = vector.broadcast %cst_7 : f32 to vector<8x128xf32>
    %21 = arith.addf %20, %19 : vector<8x128xf32>
    %22 = arith.mulf %16, %21 : vector<8x128xf32>
    %c0_8 = arith.constant 0 : index
    %c0_9 = arith.constant 0 : index
    %23 = vector.load %arg7[%c0_8, %c0_9] : memref<8x128xf32, #tpu.memory_space<vmem>>, vector<8x128xf32>
    %cst_10 = arith.constant dense<0.000000e+00> : vector<8x128xf32>
    %24 = tpu.matmul %22, %10, %cst_10 {dimension_numbers = #tpu.dot_dimension_numbers<[1], [0], [0], [1], [0, 0, 1, 1], [], []>} : vector<8x128xf32>, vector<128x128xf32>, vector<8x128xf32> -> vector<8x128xf32>
    %25 = arith.addf %23, %24 : vector<8x128xf32>
    %c0_11 = arith.constant 0 : index
    %c0_12 = arith.constant 0 : index
    %26 = vector.load %arg7[%c0_11, %c0_12] : memref<8x128xf32, #tpu.memory_space<vmem>>, vector<8x128xf32>
    tpu.vector_store %arg7[%c0_11, %c0_12], %25 {strides = array<i32>} : memref<8x128xf32, #tpu.memory_space<vmem>>, vector<8x128xf32>,
    return
  }
  func.func @transform_0(%arg0: i32, %arg1: i32) -> (i32, i32) {
    %c0_i32 = arith.constant 0 : i32
    %c0_i32_0 = arith.constant 0 : i32
    return %arg0, %c0_i32 : i32, i32
  }
  func.func @transform_1(%arg0: i32, %arg1: i32) -> (i32, i32) {
    %c0_i32 = arith.constant 0 : i32
    %c0_i32_0 = arith.constant 0 : i32
    %c0_i32_1 = arith.constant 0 : i32
    return %c0_i32, %c0_i32_0 : i32, i32
  }
  func.func @transform_2(%arg0: i32, %arg1: i32) -> (i32, i32) {
    %c0_i32 = arith.constant 0 : i32
    %c0_i32_0 = arith.constant 0 : i32
    %c0_i32_1 = arith.constant 0 : i32
    return %c0_i32, %c0_i32_0 : i32, i32
  }
  func.func @transform_3(%arg0: i32, %arg1: i32) -> (i32, i32) {
    %c0_i32 = arith.constant 0 : i32
    %c0_i32_0 = arith.constant 0 : i32
    %c0_i32_1 = arith.constant 0 : i32
    return %c0_i32, %c0_i32_0 : i32, i32
  }
  func.func @transform_4(%arg0: i32, %arg1: i32) -> (i32, i32) {
    %c0_i32 = arith.constant 0 : i32
    %c0_i32_0 = arith.constant 0 : i32
    %c0_i32_1 = arith.constant 0 : i32
    return %c0_i32, %c0_i32_0 : i32, i32
  }
  func.func @transform_5(%arg0: i32, %arg1: i32) -> (i32, i32) {
    %c0_i32 = arith.constant 0 : i32
    %c0_i32_0 = arith.constant 0 : i32
    return %arg0, %c0_i32 : i32, i32
  }
}

</mosaic_0001>

<bundles_post_ra>
// kernel: mlp_block.1
= control target key start
LH: loop header
LB: loop body
LE: loop exit
PB: predicated region body
PF: predicated region fallthrough
CT: control target
= control target key end

     0   :  { %s752_s18 = smov 0   ;;  %s754_s19 = smov 0   ;;  %s914_s0 = inlined_call_operand.vmem [shape: f32[16,128], index: 0, kind: input, shape index: {}]   ;;  %s915_s1 = inlined_call_operand.vmem [shape: f32[128,128], index: 1, kind: input, shape index: {}]   ;;  %s916_s2 = inlined_call_operand.vmem [shape: f32[1,128], index: 2, kind: input, shape index: {}]   ;;  %s917_s3 = inlined_call_operand.vmem [shape: f32[128,128], index: 3, kind: input, shape index: {}]   ;;  %s918_s4 = inlined_call_operand.vmem [shape: f32[1,128], index: 4, kind: input, shape index: {}]   ;;  %s919_s5 = inlined_call_operand.vmem [shape: f32[16,128], index: 5, kind: output, shape index: {}]  }
   0x1   :  { %s756_s20 = smov 0  }
   0x2 LB: > { %s27_s21 = sadd.s32 1, %s713_s19  ;;  %p507_p0 = scmp.ge.s32.totalorder %s717_s20, 1  ;;  %s717_s20 = sphi %s756_s20, %s15_s20   ;;  %s713_s19 = sphi %s754_s19, %s921_s19   ;;  %s709_s18 = sphi %s752_s18, %s920_s18  }
   0x3   : > { %p29_p1 = scmp.ge.s32.totalorder %s27_s21, 2  ;;  %p198_p2 = scmp.lt.s32.totalorder %s717_s20, 3 }
   0x5   : > { %s923_s21 = smov (%p29_p1, %s27_s21), 0  ;;  %p199_p3 = pnand %p507_p0, %p198_p2 }
   0x6   : > { %v248_v0 = vld [vmem:[%s915_s1] sm:$0xff] (!%p199_p3)  ;;  %v249_v1 = vld [vmem:[%s915_s1 + $0x8] sm:$0xff] (!%p199_p3)  ;;  %v250_v2 = vld [vmem:[%s915_s1 + $0x10] sm:$0xff] (!%p199_p3)  ;;  %v719_v3 = vmov (!%p199_p3), 0.0|0.0   ;;  %vm720_vm0 = vmmov (!%p199_p3), 0   ;;  %v721_v6 = vmov (!%p199_p3), 0.0  }
   0x7   : > { %202 = sbr.rel (%p199_p3) target bundleno = 486 (0x1e6), region = 40  ;;  %618 = vmatprep.subr.bf16.mxu0 (!%p199_p3), %v719_v3  ;;  %v619_v4 = vpack.c.bf16 (!%p199_p3), %v249_v1, %v248_v0  ;;  %v251_v5 = vld [vmem:[%s915_s1 + $0x18] sm:$0xff] (!%p199_p3)  ;;  %580 = vmatprep.mubr.msk.f32.mxu0 (!%p199_p3), %vm720_vm0, %v721_v6  ;;  %v252_v8 = vld [vmem:[%s915_s1 + $0x20] sm:$0xff] (!%p199_p3)  ;;  %v253_v9 = vld [vmem:[%s915_s1 + $0x28] sm:$0xff] (!%p199_p3)  ;;  %p224_p4 = scmp.lt.s32.totalorder (!%p199_p3), %s709_s18, 1 }
   0x8   : > { %642 = vmatprep.subr.bf16.mxu1 (!%p199_p3), %v719_v3  ;;  %615 = vmatprep.mubr.msk.f32.mxu1 (!%p199_p3), %vm720_vm0, %v721_v6  ;;  %v622_v7 = vpack.c.bf16 (!%p199_p3), %v251_v5, %v250_v2  ;;  %v267_v10 = vld [vmem:[%s917_s3] sm:$0xff] (!%p199_p3)  ;;  %v268_v11 = vld [vmem:[%s917_s3 + $0x8] sm:$0xff] (!%p199_p3)  ;;  %v269_v13 = vld [vmem:[%s917_s3 + $0x10] sm:$0xff] (!%p199_p3)  ;;  %v625_v15 = vpack.c.bf16 (!%p199_p3), %v253_v9, %v252_v8 }
   0x9   : > { %620 = vmatpush3.bf16.msra.mxu0 (!%p199_p3), %v619_v4  ;;  %v643_v12 = vpack.c.bf16 (!%p199_p3), %v268_v11, %v267_v10  ;;  %v270_v14 = vld [vmem:[%s917_s3 + $0x18] sm:$0xff] (!%p199_p3)  ;;  %v254_v16 = vld [vmem:[%s915_s1 + $0x30] sm:$0xff] (!%p199_p3)  ;;  %v271_v19 = vld [vmem:[%s917_s3 + $0x20] sm:$0xff] (!%p199_p3) }
   0xa   : > { %621 = vmatprep.subr.bf16.mxu0 (!%p199_p3), %v719_v3  ;;  %v255_v17 = vld [vmem:[%s915_s1 + $0x38] sm:$0xff] (!%p199_p3)  ;;  %v646_v18 = vpack.c.bf16 (!%p199_p3), %v270_v14, %v269_v13  ;;  %v272_v20 = vld [vmem:[%s917_s3 + $0x28] sm:$0xff] (!%p199_p3)  ;;  %v256_v22 = vld [vmem:[%s915_s1 + $0x40] sm:$0xff] (!%p199_p3) }
   0xb   : > { %644 = vmatpush3.bf16.msra.mxu1 (!%p199_p3), %v643_v12  ;;  %v628_v21 = vpack.c.bf16 (!%p199_p3), %v255_v17, %v254_v16  ;;  %v257_v23 = vld [vmem:[%s915_s1 + $0x48] sm:$0xff] (!%p199_p3)  ;;  %v649_v24 = vpack.c.bf16 (!%p199_p3), %v272_v20, %v271_v19  ;;  %v258_v26 = vld [vmem:[%s915_s1 + $0x50] sm:$0xff] (!%p199_p3)  ;;  %v259_v27 = vld [vmem:[%s915_s1 + $0x58] sm:$0xff] (!%p199_p3) }
   0xc   : > { %645 = vmatprep.subr.bf16.mxu1 (!%p199_p3), %v719_v3  ;;  %v631_v25 = vpack.c.bf16 (!%p199_p3), %v257_v23, %v256_v22  ;;  %v634_v28 = vpack.c.bf16 (!%p199_p3), %v259_v27, %v258_v26  ;;  %v260_v29 = vld [vmem:[%s915_s1 + $0x60] sm:$0xff] (!%p199_p3)  ;;  %v261_v30 = vld [vmem:[%s915_s1 + $0x68] sm:$0xff] (!%p199_p3)  ;;  %v262_v32 = vld [vmem:[%s915_s1 + $0x70] sm:$0xff] (!%p199_p3) }
   0xd   : > { %623 = vmatpush3.bf16.msra.mxu0 (!%p199_p3), %v622_v7  ;;  %v637_v31 = vpack.c.bf16 (!%p199_p3), %v261_v30, %v260_v29  ;;  %v263_v33 = vld [vmem:[%s915_s1 + $0x78] sm:$0xff] (!%p199_p3)  ;;  %v273_v36 = vld [vmem:[%s917_s3 + $0x30] sm:$0xff] (!%p199_p3)  ;;  %v275_v39 = vld [vmem:[%s917_s3 + $0x40] sm:$0xff] (!%p199_p3) }
   0xe   : > { %624 = vmatprep.subr.bf16.mxu0 %v719_v3  ;;  %s925_s18 = smov (!%p224_p4, %s709_s18), 1  ;;  %v640_v34 = vpack.c.bf16 %v263_v33, %v262_v32  ;;  %v274_v37 = vld [vmem:[%s917_s3 + $0x38] sm:$0xff]  ;;  %v276_v40 = vld [vmem:[%s917_s3 + $0x48] sm:$0xff]  ;;  %v277_v42 = vld [vmem:[%s917_s3 + $0x50] sm:$0xff] }
   0xf   : > { %647 = vmatpush3.bf16.msra.mxu1 %v646_v18  ;;  %s508_s24 = sshll.u32 %s925_s18, 3  ;;  %v652_v38 = vpack.c.bf16 %v274_v37, %v273_v36  ;;  %v655_v41 = vpack.c.bf16 %v276_v40, %v275_v39  ;;  %v278_v43 = vld [vmem:[%s917_s3 + $0x58] sm:$0xff]  ;;  %v279_v45 = vld [vmem:[%s917_s3 + $0x60] sm:$0xff]  ;;  %v280_v46 = vld [vmem:[%s917_s3 + $0x68] sm:$0xff] }
  0x10   : > { %648 = vmatprep.subr.bf16.mxu1 %v719_v3  ;;  %s227_s27 = scalar_lea.vmem %s914_s0, %s508_s24  ;;  %v658_v44 = vpack.c.bf16 %v278_v43, %v277_v42  ;;  %v661_v47 = vpack.c.bf16 %v280_v46, %v279_v45  ;;  %v281_v48 = vld [vmem:[%s917_s3 + $0x70] sm:$0xff]  ;;  %v282_v49 = vld [vmem:[%s917_s3 + $0x78] sm:$0xff]  ;;  %v511_v51 = vld [vmem:[%s916_s2] ss:$0 sm:$0xff]  ;;  %s231_s9 = scalar_lea.vmem %s919_s5, %s508_s24 }
  0x11   : > { %626 = vmatpush3.bf16.msra.mxu0 %v625_v15  ;;  %v283_v35 = vld [vmem:[%s227_s27] sm:$0xff]  ;;  %v664_v50 = vpack.c.bf16 %v282_v49, %v281_v48 }
  0x12   : > { %627 = vmatprep.subr.bf16.mxu0 %v719_v3  ;;  %v510_v60 = vld [vmem:[%s918_s4] ss:$0 sm:$0xff] }
  0x13   : > { %650 = vmatpush3.bf16.msra.mxu1 %v649_v24 }
  0x14   : > { %651 = vmatprep.subr.bf16.mxu1 %v719_v3 }
  0x15   : > { %629 = vmatpush3.bf16.msra.mxu0 %v628_v21 }
  0x16   : > { %630 = vmatprep.subr.bf16.mxu0 %v719_v3 }
  0x17   : > { %653 = vmatpush3.bf16.msra.mxu1 %v652_v38 }
  0x18   : > { %654 = vmatprep.subr.bf16.mxu1 %v719_v3 }
  0x19   : > { %632 = vmatpush3.bf16.msra.mxu0 %v631_v25 }
  0x1a   : > { %633 = vmatprep.subr.bf16.mxu0 %v719_v3 }
  0x1b   : > { %656 = vmatpush3.bf16.msra.mxu1 %v655_v41 }
  0x1c   : > { %657 = vmatprep.subr.bf16.mxu1 %v719_v3 }
  0x1d   : > { %635 = vmatpush3.bf16.msra.mxu0 %v634_v28 }
  0x1e   : > { %636 = vmatprep.subr.bf16.mxu0 %v719_v3 }
  0x1f   : > { %659 = vmatpush3.bf16.msra.mxu1 %v658_v44 }
  0x20   : > { %660 = vmatprep.subr.bf16.mxu1 %v719_v3 }
  0x21   : > { %638 = vmatpush3.bf16.msra.mxu0 %v637_v31 }
  0x22   : > { %639 = vmatprep.subr.bf16.mxu0 %v719_v3 }
  0x23   : > { %662 = vmatpush3.bf16.msra.mxu1 %v661_v47 }
  0x24   : > { %663 = vmatprep.subr.bf16.mxu1 %v719_v3 }
  0x25   : > { %641 = vmatpush3.bf16.msra.mxu0 %v640_v34 }
  0x27   : > { %665 = vmatpush3.bf16.msra.mxu1 %v664_v50 }
  0x28   : > { %581 = vmatmul.mubr.f32.vlgmr.msra.gmra.mrb[0].mxu0 %v283_v35 }
  0xfb   : > { %v356_v52 = vpop.f32.mrb[0].mxu0 }
  0xfc   : > { %v357_v53 = vadd.f32 %v511_v51, %v356_v52  ;;  %v582_v54 = vpop.f32.mrb[1].mxu0 }
  0xfe   : > { %v361_v55 = vmul.f32 0.70710677, %v357_v53  ;;  %v360_v57 = vmul.f32 0.5, %v357_v53 }
 0x100   : > { %693 = verf.f32 %v361_v55 }
 0x10a   : > { %v694_v56 = vpop.eup %693 }
 0x10b   : > { %v363_v58 = vadd.f32 1.0, %v694_v56 }
 0x10d   : > { %v364_v59 = vmul.f32 %v363_v58, %v360_v57 }
 0x10f   : > { %616 = vmatmul.mubr.f32.vlgmr.msra.gmra.mrb[0].mxu1 %v364_v59 }
 0x1e2   : > { %v432_v61 = vpop.f32.mrb[0].mxu1 }
 0x1e3   : > { %v436_v62 = vadd.f32 %v510_v60, %v432_v61  ;;  %v617_v63 = vpop.f32.mrb[1].mxu1 }
 0x1e5   : > { %437 = vst [vmem:[%s231_s9] sm:$0xff] %v436_v62 }
 0x1e6 PF: > { %s15_s20 = sadd.s32 1, %s717_s20   ;;  %s920_s18 = smov %s713_s19 }
 0x1e7   : > { %p12_p5 = scmp.ge.s32.totalorder %s15_s20, 4   ;;  %s921_s19 = smov %s923_s21 }
 0x1e9   :  { %14 = sbr.rel (!%p12_p5) target bundleno = 2 (0x2), region = 77 }

</bundles_post_ra>
